<compile_context>
chip_gen: v5e
topology: v5e:2x2
jax: 0.10.0
libtpu: 0.0.40
codegen_flags: <defaults>
</compile_context>

<pallas_src>
import jax
import jax.numpy as jnp
import numpy as np
from jax.experimental import pallas as pl
from jax.experimental.pallas import tpu as pltpu


def _se_kernel(x_ref, w1_ref, b1_ref, w2_ref, b2_ref, o_ref):
    # x_ref block: (1, C, HW)   — C on sublanes, HW on lanes (lane-dense).
    # w1_ref:      (C, S)       — reduce weights, w1[c, s]
    # b1_ref:      (1, S)
    # w2_ref:      (C, S)       — expand weights, w2[c, s]
    # b2_ref:      (C, 1)
    x = x_ref[0]                                   # (C, HW), native dtype
    hw = x_ref.shape[-1]                           # static
    inv_hw = jnp.float32(1.0 / hw)

    # Global average pool over spatial positions: lane reduce (XLU), f32 acc.
    pooled = jnp.sum(x.astype(jnp.float32), axis=-1, keepdims=True) * inv_hw  # (C, 1)

    # se_reduce (C -> S) + ReLU, on the VPU: broadcast-mul + sublane reduce.
    h = jnp.sum(pooled * w1_ref[...], axis=0, keepdims=True) + b1_ref[...]    # (1, S)
    h = jnp.maximum(h, 0.0)

    # se_expand (S -> C) + sigmoid: broadcast-mul + lane reduce -> (C, 1).
    g = jnp.sum(h * w2_ref[...], axis=1, keepdims=True) + b2_ref[...]         # (C, 1)
    g = jax.nn.sigmoid(g)                                                     # f32

    # Scale every spatial position by the per-channel gate (lane broadcast).
    # Keep x in its native dtype for the dominant elementwise stage.
    o_ref[0] = (x * g.astype(x.dtype)).astype(o_ref.dtype)


def squeeze_and_excite(x_nchw, w_reduce, b_reduce, w_expand, b_expand):
    """SE forward.

    x_nchw:   (N, C, H, W)
    w_reduce: (S, C)   — se_reduce conv weight squeezed (PyTorch (S, C, 1, 1))
    b_reduce: (S,)
    w_expand: (C, S)   — se_expand conv weight squeezed (PyTorch (C, S, 1, 1))
    b_expand: (C,)
    """
    N, C, H, W = x_nchw.shape
    S = w_reduce.shape[0]
    HW = H * W

    # Free reshape (no transpose, no extra HBM traffic).
    x = x_nchw.reshape(N, C, HW)

    # Tiny, one-off weight layout prep so the kernel needs no transposes.
    w1 = jnp.transpose(w_reduce)          # (C, S)
    b1 = b_reduce.reshape(1, S)           # (1, S)
    w2 = w_expand                         # (C, S)
    b2 = b_expand.reshape(C, 1)           # (C, 1)

    # VMEM budget: double-buffered input + output image blocks + params.
    itemsize = jnp.dtype(x_nchw.dtype).itemsize
    img_block_bytes = C * HW * itemsize
    param_bytes = 4 * (w1.size + b1.size + w2.size + b2.size)
    vmem_need = 2 * (2 * img_block_bytes) + 2 * param_bytes + (1 << 20)
    # Raise above the 16/32 MiB scoped defaults, stay under v7x's 64 MiB.
    vmem_limit = int(min(max(vmem_need, 32 << 20), 64 << 20))

    out = pl.pallas_call(
        _se_kernel,
        out_shape=jax.ShapeDtypeStruct((N, C, HW), x_nchw.dtype),
        grid_spec=pltpu.PrefetchScalarGridSpec(
            num_scalar_prefetch=0,
            grid=(N,),
            in_specs=[
                pl.BlockSpec((1, C, HW), lambda n: (n, 0, 0)),
                pl.BlockSpec((C, S), lambda n: (0, 0)),
                pl.BlockSpec((1, S), lambda n: (0, 0)),
                pl.BlockSpec((C, S), lambda n: (0, 0)),
                pl.BlockSpec((C, 1), lambda n: (0, 0)),
            ],
            out_specs=pl.BlockSpec((1, C, HW), lambda n: (n, 0, 0)),
        ),
        compiler_params=pltpu.CompilerParams(
            dimension_semantics=("parallel",),
            vmem_limit_bytes=vmem_limit,
        ),
    )(x, w1, b1, w2, b2)

    # Free reshape back to NCHW.
    return out.reshape(N, C, H, W)


def _reference(x_nchw, w_reduce, b_reduce, w_expand, b_expand):
    # Pure-JAX reference matching the PyTorch forward (NCHW).
    pooled = jnp.mean(x_nchw, axis=(2, 3))                      # (N, C)
    h = jnp.maximum(pooled @ w_reduce.T + b_reduce, 0.0)        # (N, S)
    g = jax.nn.sigmoid(h @ w_expand.T + b_expand)               # (N, C)
    return x_nchw * g[:, :, None, None]


if __name__ == "__main__":
    # Module config: channels=8, squeeze_channels=8, se_ratio=0.5 -> S=4.
    N, C, H, W = 2, 8, 16, 16
    S = int(8 * 0.5)

    key = jax.random.PRNGKey(0)
    kx, k1, kb1, k2, kb2 = jax.random.split(key, 5)

    x = jax.random.normal(kx, (N, C, H, W), dtype=jnp.float32)

    # Parameters in PyTorch-conv layout (squeezed 1x1 kernels):
    #   se_reduce.weight (S, C, 1, 1) -> (S, C);  se_expand.weight (C, S, 1, 1) -> (C, S)
    w_reduce = jax.random.normal(k1, (S, C), dtype=jnp.float32) * 0.1
    b_reduce = jax.random.normal(kb1, (S,), dtype=jnp.float32) * 0.1
    w_expand = jax.random.normal(k2, (C, S), dtype=jnp.float32) * 0.1
    b_expand = jax.random.normal(kb2, (C,), dtype=jnp.float32) * 0.1

    out = squeeze_and_excite(x, w_reduce, b_reduce, w_expand, b_expand)
    out = jax.block_until_ready(out)

    ref = _reference(x, w_reduce, b_reduce, w_expand, b_expand)
    np.testing.assert_allclose(np.asarray(out), np.asarray(ref),
                               rtol=1e-5, atol=1e-5)
    print("KERNEL_OK")
</pallas_src>

<mosaic_0001>
module attributes {stable_mosaic.version = 11 : i64} {
  func.func @_se_kernel(%arg0: i32, %arg1: memref<1x8x256xf32, #tpu.memory_space<vmem>>, %arg2: memref<8x4xf32, #tpu.memory_space<vmem>>, %arg3: memref<1x4xf32, #tpu.memory_space<vmem>>, %arg4: memref<8x4xf32, #tpu.memory_space<vmem>>, %arg5: memref<8x1xf32, #tpu.memory_space<vmem>>, %arg6: memref<1x8x256xf32, #tpu.memory_space<vmem>>) attributes {dimension_semantics = [#tpu.dimension_semantics<parallel>], iteration_bounds = array<i64: 2>, scalar_prefetch = 0 : i64, scratch_operands = 0 : i64, tpu.core_type = #tpu.core_type<tc>, window_params = [{transform_indices = @transform_0, window_bounds = array<i64: 1, 8, 256>}, {pipeline_mode = #tpu.pipeline_mode<synchronous>, transform_indices = @transform_1, window_bounds = array<i64: 8, 4>}, {pipeline_mode = #tpu.pipeline_mode<synchronous>, transform_indices = @transform_2, window_bounds = array<i64: 1, 4>}, {pipeline_mode = #tpu.pipeline_mode<synchronous>, transform_indices = @transform_3, window_bounds = array<i64: 8, 4>}, {pipeline_mode = #tpu.pipeline_mode<synchronous>, transform_indices = @transform_4, window_bounds = array<i64: 8, 1>}, {transform_indices = @transform_5, window_bounds = array<i64: 1, 8, 256>}]} {
    %c0 = arith.constant 0 : index
    %c0_0 = arith.constant 0 : index
    %c0_1 = arith.constant 0 : index
    %0 = vector.load %arg1[%c0, %c0_0, %c0_1] : memref<1x8x256xf32, #tpu.memory_space<vmem>>, vector<1x8x256xf32>
    %1 = vector.shape_cast %0 : vector<1x8x256xf32> to vector<8x256xf32>
    %cst = arith.constant dense<0.000000e+00> : vector<8xf32>
    %2 = vector.multi_reduction <add>, %1, %cst [1] : vector<8x256xf32> to vector<8xf32>
    %3 = vector.shape_cast %2 : vector<8xf32> to vector<8x1xf32>
    %cst_2 = arith.constant 3.906250e-03 : f32
    %4 = vector.broadcast %cst_2 : f32 to vector<8x1xf32>
    %5 = arith.mulf %3, %4 : vector<8x1xf32>
    %c0_3 = arith.constant 0 : index
    %c0_4 = arith.constant 0 : index
    %6 = vector.load %arg2[%c0_3, %c0_4] : memref<8x4xf32, #tpu.memory_space<vmem>>, vector<8x4xf32>
    %7 = vector.broadcast %5 : vector<8x1xf32> to vector<8x4xf32>
    %8 = arith.mulf %7, %6 : vector<8x4xf32>
    %cst_5 = arith.constant dense<0.000000e+00> : vector<4xf32>
    %9 = vector.multi_reduction <add>, %8, %cst_5 [0] : vector<8x4xf32> to vector<4xf32>
    %10 = vector.shape_cast %9 : vector<4xf32> to vector<1x4xf32>
    %c0_6 = arith.constant 0 : index
    %c0_7 = arith.constant 0 : index
    %11 = vector.load %arg3[%c0_6, %c0_7] : memref<1x4xf32, #tpu.memory_space<vmem>>, vector<1x4xf32>
    %12 = arith.addf %10, %11 : vector<1x4xf32>
    %cst_8 = arith.constant 0.000000e+00 : f32
    %13 = vector.broadcast %cst_8 : f32 to vector<1x4xf32>
    %14 = arith.maximumf %12, %13 : vector<1x4xf32>
    %c0_9 = arith.constant 0 : index
    %c0_10 = arith.constant 0 : index
    %15 = vector.load %arg4[%c0_9, %c0_10] : memref<8x4xf32, #tpu.memory_space<vmem>>, vector<8x4xf32>
    %16 = vector.broadcast %14 : vector<1x4xf32> to vector<8x4xf32>
    %17 = arith.mulf %16, %15 : vector<8x4xf32>
    %cst_11 = arith.constant dense<0.000000e+00> : vector<8xf32>
    %18 = vector.multi_reduction <add>, %17, %cst_11 [1] : vector<8x4xf32> to vector<8xf32>
    %19 = vector.shape_cast %18 : vector<8xf32> to vector<8x1xf32>
    %c0_12 = arith.constant 0 : index
    %c0_13 = arith.constant 0 : index
    %20 = vector.load %arg5[%c0_12, %c0_13] : memref<8x1xf32, #tpu.memory_space<vmem>>, vector<8x1xf32>
    %21 = arith.addf %19, %20 : vector<8x1xf32>
    %22 = arith.negf %21 : vector<8x1xf32>
    %23 = math.exp %22 : vector<8x1xf32>
    %cst_14 = arith.constant 1.000000e+00 : f32
    %24 = vector.broadcast %cst_14 : f32 to vector<8x1xf32>
    %25 = arith.addf %24, %23 : vector<8x1xf32>
    %26 = arith.divf %24, %25 : vector<8x1xf32>
    %27 = vector.broadcast %26 : vector<8x1xf32> to vector<8x256xf32>
    %28 = arith.mulf %1, %27 : vector<8x256xf32>
    %c0_15 = arith.constant 0 : index
    %c0_16 = arith.constant 0 : index
    %c0_17 = arith.constant 0 : index
    %29 = vector.load %arg6[%c0_15, %c0_16, %c0_17] : memref<1x8x256xf32, #tpu.memory_space<vmem>>, vector<1x8x256xf32>
    %30 = vector.shape_cast %29 : vector<1x8x256xf32> to vector<8x256xf32>
    %31 = vector.shape_cast %28 : vector<8x256xf32> to vector<1x8x256xf32>
    tpu.vector_store %arg6[%c0_15, %c0_16, %c0_17], %31 {strides = array<i32>} : memref<1x8x256xf32, #tpu.memory_space<vmem>>, vector<1x8x256xf32>,
    return
  }
  func.func @transform_0(%arg0: i32) -> (i32, i32, i32) {
    %c0_i32 = arith.constant 0 : i32
    %c0_i32_0 = arith.constant 0 : i32
    %c0_i32_1 = arith.constant 0 : i32
    return %arg0, %c0_i32, %c0_i32_0 : i32, i32, i32
  }
  func.func @transform_1(%arg0: i32) -> (i32, i32) {
    %c0_i32 = arith.constant 0 : i32
    %c0_i32_0 = arith.constant 0 : i32
    %c0_i32_1 = arith.constant 0 : i32
    return %c0_i32, %c0_i32_0 : i32, i32
  }
  func.func @transform_2(%arg0: i32) -> (i32, i32) {
    %c0_i32 = arith.constant 0 : i32
    %c0_i32_0 = arith.constant 0 : i32
    %c0_i32_1 = arith.constant 0 : i32
    return %c0_i32, %c0_i32_0 : i32, i32
  }
  func.func @transform_3(%arg0: i32) -> (i32, i32) {
    %c0_i32 = arith.constant 0 : i32
    %c0_i32_0 = arith.constant 0 : i32
    %c0_i32_1 = arith.constant 0 : i32
    return %c0_i32, %c0_i32_0 : i32, i32
  }
  func.func @transform_4(%arg0: i32) -> (i32, i32) {
    %c0_i32 = arith.constant 0 : i32
    %c0_i32_0 = arith.constant 0 : i32
    %c0_i32_1 = arith.constant 0 : i32
    return %c0_i32, %c0_i32_0 : i32, i32
  }
  func.func @transform_5(%arg0: i32) -> (i32, i32, i32) {
    %c0_i32 = arith.constant 0 : i32
    %c0_i32_0 = arith.constant 0 : i32
    %c0_i32_1 = arith.constant 0 : i32
    return %arg0, %c0_i32, %c0_i32_0 : i32, i32, i32
  }
}

</mosaic_0001>

<bundles_post_ra>
// kernel: tpu_custom_call.1
= control target key start
LH: loop header
LB: loop body
LE: loop exit
PB: predicated region body
PF: predicated region fallthrough
CT: control target
= control target key end

     0   :  { %10 = vsyncpa [#allocation3], 0  ;;  %s727_s0 = inlined_call_operand.hbm [shape: f32[2,8,256], index: 0, kind: input, shape index: {}]   ;;  %s728_s1 = inlined_call_operand.vmem [shape: f32[8,4], index: 1, kind: input, shape index: {}]   ;;  %s729_s2 = inlined_call_operand.vmem [shape: f32[1,4], index: 2, kind: input, shape index: {}]   ;;  %s730_s3 = inlined_call_operand.vmem [shape: f32[8,4], index: 3, kind: input, shape index: {}]   ;;  %s731_s4 = inlined_call_operand.vmem [shape: f32[8,1], index: 4, kind: input, shape index: {}]   ;;  %s732_s5 = inlined_call_operand.hbm [shape: f32[2,8,256], index: 5, kind: output, shape index: {}]  }
   0x1   :  { %12 = vsyncpa [#allocation3 + $0x1], 0 }
   0x2   :  { %13 = vsyncpa [#allocation4], 0 }
   0x3   :  { %15 = vsyncpa [#allocation4 + $0x1], 0  ;;  %s584_s18 = smov 0   ;;  %s586_s19 = smov 0  }
   0x4   :  { %s588_s20 = smov 0   ;;  %s590_s21 = smov 0  }
   0x5 LB: > { %s605_s22 = sadd.s32 4294967295, %s551_s21   ;;  %s385_s23 = sadd.s32 4294967294, %s551_s21   ;;  %s551_s21 = sphi %s590_s21, %s742_s21   ;;  %s547_s20 = sphi %s588_s20, %s741_s20   ;;  %s543_s19 = sphi %s586_s19, %s740_s19   ;;  %s539_s18 = sphi %s584_s18, %s739_s18  }
   0x6   : > { %s609_s24 = sadd.s32 1, %s551_s21   ;;  %s28_s25 = sadd.s32 1, %s547_s20 }
   0x7   : > { %s25_s26 = ssub.s32 %s551_s21, %s609_s24  ;;  %p35_p0 = scmp.ne.s32.totalorder %s547_s20, %s543_s19 }
   0x8   : > { %p26_p1 = scmp.eq.s32.totalorder %s25_s26, 0  ;;  %p36_p2 = scmp.eq.s32.totalorder %s551_s21, 0 }
   0x9   : > { %p41_p3 = scmp.ne.s32.totalorder %s543_s19, %s539_s18  ;;  %p42_p4 = scmp.eq.s32.totalorder %s605_s22, 0 }
   0xa   : > { %s621_s27 = scalar_select %p26_p1, %s547_s20, %s28_s25  }
   0xb   : > { %p623_p5 = por %p36_p2, %p35_p0  ;;  %p627_p6 = por %p42_p4, %p41_p3 }
   0xc   : > { %p149_p7 = scmp.eq.s32.totalorder %s605_s22, 1  ;;  %p155_p8 = scmp.eq.s32.totalorder %s385_s23, 1 }
   0xd   : > { %p414_p10 = scmp.lt.s32.totalorder %s551_s21, 2  ;;  %s187_s7 = sand.u32 1, %s547_s20  }
   0xe   : > { %p634_p11 = por %p149_p7, %p35_p0  ;;  %p638_p12 = por %p155_p8, %p41_p3 }
   0xf   : > { %s400_s8 = sshll.u32 %s551_s21, 4  ;;  %s388_s9 = sshll.u32 %s187_s7, 4 }
  0x10   : > { %s196_s12 = scalar_lea.hbm %s727_s0, %s400_s8  ;;  %s191_s14 = scalar_lea.vmem [#allocation2], %s388_s9 }
  0x11   : > { %s198_s13 = sshll.u32 %s196_s12, 4  ;;  %s200_s15 = sshll.u32 %s191_s14, 4  ;;  %s199_s13 = int_to_ptr.hbm [resolvable:$true] %s198_s13  ;;  %s201_s15 = int_to_ptr.vmem [resolvable:$true] %s200_s15 }
  0x12   : > { %p649_p13 = pnand %p414_p10, %p623_p5  ;;  %p391_p0 = scmp.ge.s32.totalorder %s551_s21, 1 }
  0x13   : > { %p205_p1 = scmp.lt.s32.totalorder %s551_s21, 3  ;;  %s188_s17 = scalar_lea.sflag [#allocation3], %s187_s7 }
  0x14   : > { %s455_s23 = sshra.s32 %s199_s13, 4  ;;  %p459_p3 = pneg %p649_p13  ;;  %s456_s23 = int_to_ptr.hbm [resolvable:$true] %s455_s23 }
  0x15   : > { %s457_s25 = scalar_lea.hbm %s456_s23, 16  ;;  %s462_s28 = scalar_lea.hbm %s727_s0, 32 }
  0x16   : > { %p458_p2 = scmp.ne.s32.totalorder %s456_s23, %s457_s25  ;;  %p463_p5 = scmp.lt.s32.totalorder %s456_s23, %s727_s0 }
  0x17   : > { %p464_p8 = scmp.lt.s32.totalorder %s462_s28, %s457_s25 }
  0x18   : > { %p460_p4 = pnand %p459_p3, %p458_p2 }
  0x19   : > { %p465_p10 = por %p464_p8, %p463_p5 }
  0x1a   : > { %p461_p7 = pneg %p460_p4 }
  0x1c   : > { %p466_p9 = pnand %p465_p10, %p461_p7 }
  0x1e   : > { %469 = shalt.err (!%p466_p9)
}
  0x1f   : > { %409 = dma.hbm_to_vmem [thread:$0]  (!%p649_p13), %s199_s13, 256, %s201_s15, %s188_s17  }
  0x20   : > { %p206_p2 = pnand %p391_p0, %p205_p1 }
  0x21   : > { %s670_s7 = sand.u32 (!%p206_p2), 1, %s543_s19  }
  0x22   : > { %209 = sbr.rel (%p206_p2) target bundleno = 452 (0x1c4), region = 40  ;;  %s392_s11 = sshll.u32 (!%p206_p2), %s670_s7, 4 }
  0x23   : > { %s212_s12 = scalar_lea.sflag (!%p206_p2), [#allocation3], %s670_s7  ;;  %s215_s14 = scalar_lea.vmem (!%p206_p2), [#allocation2], %s392_s11 }
  0x27   : > { %530 = dma.done.wait (%p627_p6), %s212_s12, 256  }
  0x28   : > { %532 = vsyncadd (%p627_p6), %s212_s12, 4294967040  ;;  %v243_v0 = vld [vmem:[%s215_s14] sm:$0xff]  ;;  %v244_v1 = vld [vmem:[%s215_s14 + $0x8] sm:$0xff]  ;;  %vm251_vm0 = vcmask 31744   ;;  %v553_v21 = vmov 0   ;;  %s401_s8 = sshll.u32 %s605_s22, 4 }
  0x29   : > { %v245_v2 = vadd.f32 %v244_v1, %v243_v0  ;;  %v249_v3 = vld [vmem:[%s728_s1] sm:$0xff]  ;;  %449 = vset.pattern.permute.xlu1 %v553_v21  ;;  %450 = vset.pattern.permute.xlu0 %v553_v21  ;;  %s310_s10 = scalar_lea.hbm %s732_s5, %s401_s8  ;;  %s242_s12 = scalar_lea.vmem [#allocation5], %s392_s11 }
  0x2a   : > { %v259_v13 = vld [vmem:[%s729_s2] sm:$0x1]  ;;  %s312_s14 = sshll.u32 %s242_s12, 4  ;;  %s314_s13 = sshll.u32 %s310_s10, 4  ;;  %s313_s14 = int_to_ptr.vmem [resolvable:$true] %s312_s14  ;;  %s315_s13 = int_to_ptr.hbm [resolvable:$true] %s314_s13 }
  0x2b   : > { %246 = vadd.xlane.f32.xlu0 %v245_v2  ;;  %v262_v17 = vld [vmem:[%s730_s3] sm:$0xff]  ;;  %s299_s15 = scalar_lea.sflag [#allocation4], %s670_s7  ;;  %s499_s29 = sshra.s32 %s315_s13, 4  ;;  %s500_s29 = int_to_ptr.hbm [resolvable:$true] %s499_s29 }
  0x2c   : > { %v268_v22 = vld [vmem:[%s731_s4] sm:$0xff]  ;;  %s501_s22 = scalar_lea.hbm %s500_s29, 16  ;;  %s505_s11 = scalar_lea.hbm %s732_s5, 32 }
  0x2d   : > { %p502_p6 = scmp.ne.s32.totalorder %s500_s29, %s501_s22  ;;  %p506_p0 = scmp.lt.s32.totalorder %s500_s29, %s732_s5 }
  0x2e   : > { %p507_p1 = scmp.lt.s32.totalorder %s505_s11, %s501_s22 }
  0x2f   : > { %p503_p9 = pnand %p502_p6, %p634_p11 }
  0x30   : > { %p508_p3 = por %p507_p1, %p506_p0 }
  0x31   : > { %p504_p13 = pneg %p503_p9 }
  0x33   : > { %p509_p4 = pnand %p508_p3, %p504_p13 }
  0x9e   : > { %v247_v4 = vpop.xlane.xlu0 %246 }
  0x9f   : > { %v248_v5 = vmul.f32 0.00390625, %v247_v4 }
  0xa1   : > { %v250_v6 = vmul.f32 %v249_v3, %v248_v5 }
  0xa3   : > { %v252_v7 = vsel %vm251_vm0, %v250_v6, 0.0 }
  0xa4   : > { %v253_v8 = vrot.slane %v252_v7, 4 }
  0xa6   : > { %v254_v9 = vadd.f32 %v253_v8, %v252_v7 }
  0xa8   : > { %v255_v10 = vrot.slane %v254_v9, 2 }
  0xaa   : > { %v256_v11 = vadd.f32 %v255_v10, %v254_v9 }
  0xac   : > { %v257_v12 = vrot.slane %v256_v11, 1 }
  0xae   : > { %v258_v14 = vadd.f32 %v257_v12, %v256_v11 }
  0xb0   : > { %v260_v15 = vadd.f32 %v259_v13, %v258_v14 }
  0xb2   : > { %v261_v16 = vmax.f32 %v260_v15, 0.0 }
  0xb4   : > { %v263_v18 = vperm.slane %v261_v16, 0 }
  0xb6   : > { %v264_v19 = vmul.f32 %v263_v18, %v262_v17 }
  0xb8   : > { %v265_v20 = vsel %vm251_vm0, %v264_v19, 0.0 }
  0xb9   : > { %266 = vadd.xlane.f32.xlu0 %v265_v20 }
 0x12c   : > { %v267_v23 = vpop.xlane.xlu0 %266 }
 0x12d   : > { %v269_v24 = vadd.f32 %v268_v22, %v267_v23 }
 0x12f   : > { %v394_v25 = vmul.f32 -1.442695, %v269_v24 }
 0x131   : > { %451 = vpow2.f32 %v394_v25 }
 0x137   : > { %v452_v26 = vpop.eup %451 }
 0x138   : > { %v273_v27 = vadd.f32 1.0, %v452_v26 }
 0x13a   : > { %453 = vrcp.f32 %v273_v27  ;;  %v285_v31 = vand.u32 2147483648, %v273_v27  ;;  %v283_v33 = vand.u32 2147483647, %v273_v27  ;;  %vm279_vm2 = vweird.f32 %v273_v27 }
 0x13c   : > { %v286_v35 = vor.u32 1.1754944e-38, %v285_v31  ;;  %vm284_vm4 = vcmp.eq.f32.partialorder %v283_v33, 8.507059e+37 }
 0x140   : > { %v454_v28 = vpop.eup %453 }
 0x141   : > { %v275_v29 = vmul.f32 %v454_v28, %v273_v27  ;;  %vm280_vm1 = vweird.f32 %v454_v28 }
 0x142   : > { %vm281_vm3 = vmor %vm279_vm2, %vm280_vm1 }
 0x143   : > { %v276_v30 = vsub.f32 1.0, %v275_v29 }
 0x145   : > { %v277_v32 = vmul.f32 %v454_v28, %v276_v30 }
 0x147   : > { %v278_v34 = vadd.f32 %v454_v28, %v277_v32 }
 0x149   : > { %v282_v36 = vsel %vm281_vm3, %v454_v28, %v278_v34 }
 0x14a   : > { %v287_v37 = vsel %vm284_vm4, %v286_v35, %v282_v36 }
 0x14b   : > { %291 = vperm.xlu1 %449, %v287_v37  }
 0x1bd   : > { %v292_v38 = vpop.permute.xlu1 %291 }
 0x1be   : > { %v294_v39 = vmul.f32 %v292_v38, %v243_v0  ;;  %v295_v40 = vmul.f32 %v292_v38, %v244_v1 }
 0x1c0   : > { %296 = vst [vmem:[%s242_s12] sm:$0xff] %v294_v39 }
 0x1c1   : > { %297 = vst [vmem:[%s242_s12 + $0x8] sm:$0xff] %v295_v40 }
 0x1c2   : > { %512 = shalt.err (!%p509_p4)
}
 0x1c3   : > { %404 = dma.vmem_to_hbm [thread:$0]  (%p634_p11), %s313_s14, 256, %s315_s13, %s299_s15  }
 0x1c4 PF: > { %s326_s7 = sand.u32 1, %s539_s18   ;;  %p738_p7 = scmp.ge.s32.totalorder %s551_s21, 2 }
 0x1c5   : > { %s327_s26 = scalar_lea.sflag [#allocation4], %s326_s7 }
 0x1c6   : > { %p411_p5 = pnand %p738_p7, %p638_p12 }
 0x1c8   : > { %p412_p8 = pneg %p411_p5 }
 0x1ca   : > { %534 = dma.done.wait (%p412_p8), %s327_s26, 256  }
 0x1cb   : > { %536 = vsyncadd (%p412_p8), %s327_s26, 4294967040  ;;  %p18_p10 = scmp.ge.s32.totalorder %s609_s24, 4   ;;  %s739_s18 = smov %s543_s19 }
 0x1cc   : > { %s740_s19 = smov %s547_s20  ;;  %s741_s20 = smov %s621_s27 }
 0x1cd   : > { %s742_s21 = smov %s609_s24  ;;  %20 = sbr.rel (!%p18_p10) target bundleno = 5 (0x5), region = 85 }
 0x1d2   :  { %333 = vsyncpa [#allocation3], 1 }
 0x1d3   :  { %335 = vsyncpa [#allocation3 + $0x1], 1 }
 0x1d4   :  { %336 = vsyncpa [#allocation4], 1 }
 0x1d5   :  { %338 = vsyncpa [#allocation4 + $0x1], 1 }

</bundles_post_ra>
